<compile_context>
chip_gen: v7x
topology: tpu7x:2x2x1
jax: 0.10.0
libtpu: 0.0.40
codegen_flags: <defaults>
</compile_context>

<pallas_src>
import functools

import numpy as np
import jax
import jax.numpy as jnp
from jax.experimental import pallas as pl
from jax.experimental.pallas import tpu as pltpu


# ----------------------------- Pallas kernel -----------------------------

def sinusoidal_kernel(t_ref, tab_ref, o_ref):
    """o[b, d] = sin(t[b] * tab[0, d] + tab[1, d])

    tab[0] = [inv_freq, inv_freq]            (duplicated to full embed_dim width)
    tab[1] = [0 ... 0, pi/2 ... pi/2]        (so the cos half is sin(x + pi/2))
    One EUP transcendental per element, one dense full-width store.
    """
    ang = t_ref[...] * tab_ref[0:1, :] + tab_ref[1:2, :]   # (TB,1)*(1,D)+(1,D) -> (TB,D)
    o_ref[...] = jnp.sin(ang)


# ----------------------------- host-side constants (memoized) -----------------------------

@functools.lru_cache(maxsize=None)
def _freq_phase_table(embed_dim):
    half = embed_dim // 2
    positions = np.arange(half, dtype=np.float32)
    inv_freq = 1.0 / (10000.0 ** (positions / (half - 1)))            # exact PyTorch formula
    row_freq = np.concatenate([inv_freq, inv_freq]).astype(np.float32)
    row_phase = np.concatenate(
        [np.zeros(half, np.float32), np.full(half, np.pi / 2.0, np.float32)])
    return jnp.asarray(np.stack([row_freq, row_phase], axis=0))        # (2, embed_dim)


# ----------------------------- tile selection -----------------------------

def _pick_batch_tile(B, embed_dim):
    """Largest 8-aligned divisor of B whose f32 output block stays under ~4 MiB.

    Prefers >= 2 grid steps for lane-dense outputs (embed_dim >= 128) and B >= 16
    so the 'parallel' grid axis can shard across v7x's two TensorCores.  Tiny or
    non-8-divisible batches fall back to a single whole-array block.
    """
    bytes_per_row = embed_dim * 4
    cap = 4 * 1024 * 1024                              # per-block cap (~8 MiB double-buffered)
    divs = [d for d in range(8, B, 8) if B % d == 0]   # 8-aligned proper divisors (<= B//2)
    fitting = [d for d in divs if d * bytes_per_row <= cap]

    if B >= 16 and B % 8 == 0 and embed_dim >= 128 and fitting:
        return max(fitting)                            # >= 2 grid steps, VMEM-safe
    if B * bytes_per_row > cap and fitting:
        return max(fitting)                            # whole block too big -> tile anyway
    return B                                           # single whole-array block


# ----------------------------- wrapper -----------------------------

def sinusoidal_time_embedding(t, embed_dim):
    """t: (B,) integer or float timesteps  ->  (B, embed_dim) float32 embedding."""
    assert embed_dim % 2 == 0, "embed_dim must be even (sin/cos halves)"
    assert embed_dim >= 4, "embed_dim must be >= 4 (half - 1 appears in a denominator)"

    B = t.shape[0]
    tab = _freq_phase_table(embed_dim)                 # (2, embed_dim), memoized per dim
    t2 = t.astype(jnp.float32).reshape(B, 1)

    tb = _pick_batch_tile(B, embed_dim)
    grid = (B // tb,)

    cost = pl.CostEstimate(
        flops=2 * B * embed_dim,                       # mul + add per element
        transcendentals=B * embed_dim,                 # one sin per element
        bytes_accessed=4 * (B * embed_dim + B + 2 * embed_dim),
    )

    return pl.pallas_call(
        sinusoidal_kernel,
        out_shape=jax.ShapeDtypeStruct((B, embed_dim), jnp.float32),
        grid=grid,
        in_specs=[
            pl.BlockSpec((tb, 1), lambda i: (i, 0)),             # per-tile timesteps
            pl.BlockSpec((2, embed_dim), lambda i: (0, 0)),      # shared freq/phase table
        ],
        out_specs=pl.BlockSpec((tb, embed_dim), lambda i: (i, 0)),
        compiler_params=pltpu.CompilerParams(dimension_semantics=("parallel",)),
        cost_estimate=cost,
    )(t2, tab)


# ----------------------------- pure-JAX reference -----------------------------

def sinusoidal_reference(t, embed_dim):
    half = embed_dim // 2
    positions = jnp.arange(half, dtype=jnp.float32)
    inv_freq = 1.0 / (10000.0 ** (positions / (half - 1)))
    ang = jnp.outer(t.astype(jnp.float32), inv_freq)
    return jnp.concatenate([jnp.sin(ang), jnp.cos(ang)], axis=1)


# ----------------------------- main -----------------------------

if __name__ == "__main__":
    key = jax.random.PRNGKey(0)
    k1, k2 = jax.random.split(key)

    # Small shape implied by the module: t is [B] timestep indices; emb is [B, embed_dim].
    # embed_dim < 128 -> single whole-array block (launch-latency dominated; no tiling).
    B, embed_dim = 2, 32
    t = jax.random.randint(k1, (B,), 0, 1000, dtype=jnp.int32)

    emb = jax.block_until_ready(sinusoidal_time_embedding(t, embed_dim))
    ref = sinusoidal_reference(t, embed_dim)
    assert emb.shape == (B, embed_dim), emb.shape
    err = float(jnp.max(jnp.abs(emb - ref)))
    assert err < 5e-3, f"max abs diff too large: {err}"

    # Lane-dense case exercising the auto-tiled grid path (B=64, D=256 -> tb=32, grid=(2,)).
    B2, D2 = 64, 256
    t_big = jax.random.randint(k2, (B2,), 0, 1000, dtype=jnp.int32)
    emb2 = jax.block_until_ready(sinusoidal_time_embedding(t_big, D2))
    ref2 = sinusoidal_reference(t_big, D2)
    assert emb2.shape == (B2, D2), emb2.shape
    err2 = float(jnp.max(jnp.abs(emb2 - ref2)))
    assert err2 < 5e-3, f"max abs diff too large (tiled): {err2}"

    print("KERNEL_OK")
</pallas_src>

<mosaic_0001>
module attributes {stable_mosaic.version = 11 : i64} {
  func.func @sinusoidal_kernel(%arg0: i32, %arg1: memref<2x1xf32, #tpu.memory_space<vmem>>, %arg2: memref<2x32xf32, #tpu.memory_space<vmem>>, %arg3: memref<2x32xf32, #tpu.memory_space<vmem>>) attributes {dimension_semantics = [#tpu.dimension_semantics<parallel>], iteration_bounds = array<i64: 1>, scalar_prefetch = 0 : i64, scratch_operands = 0 : i64, tpu.core_type = #tpu.core_type<tc>, window_params = [{transform_indices = @transform_0, window_bounds = array<i64: 2, 1>}, {pipeline_mode = #tpu.pipeline_mode<synchronous>, transform_indices = @transform_1, window_bounds = array<i64: 2, 32>}, {transform_indices = @transform_2, window_bounds = array<i64: 2, 32>}]} {
    %c0 = arith.constant 0 : index
    %c0_0 = arith.constant 0 : index
    %0 = vector.load %arg1[%c0, %c0_0] : memref<2x1xf32, #tpu.memory_space<vmem>>, vector<2x1xf32>
    %c0_1 = arith.constant 0 : index
    %c0_2 = arith.constant 0 : index
    %1 = vector.load %arg2[%c0_1, %c0_2] : memref<2x32xf32, #tpu.memory_space<vmem>>, vector<1x32xf32>
    %2 = vector.broadcast %0 : vector<2x1xf32> to vector<2x32xf32>
    %3 = vector.broadcast %1 : vector<1x32xf32> to vector<2x32xf32>
    %4 = arith.mulf %2, %3 : vector<2x32xf32>
    %c1 = arith.constant 1 : index
    %c0_3 = arith.constant 0 : index
    %5 = vector.load %arg2[%c1, %c0_3] : memref<2x32xf32, #tpu.memory_space<vmem>>, vector<1x32xf32>
    %6 = vector.broadcast %5 : vector<1x32xf32> to vector<2x32xf32>
    %7 = arith.addf %4, %6 : vector<2x32xf32>
    %8 = math.sin %7 : vector<2x32xf32>
    %c0_4 = arith.constant 0 : index
    %c0_5 = arith.constant 0 : index
    %9 = vector.load %arg3[%c0_4, %c0_5] : memref<2x32xf32, #tpu.memory_space<vmem>>, vector<2x32xf32>
    tpu.vector_store %arg3[%c0_4, %c0_5], %8 {strides = array<i32>} : memref<2x32xf32, #tpu.memory_space<vmem>>, vector<2x32xf32>,
    return
  }
  func.func @transform_0(%arg0: i32) -> (i32, i32) {
    %c0_i32 = arith.constant 0 : i32
    %c0_i32_0 = arith.constant 0 : i32
    return %arg0, %c0_i32 : i32, i32
  }
  func.func @transform_1(%arg0: i32) -> (i32, i32) {
    %c0_i32 = arith.constant 0 : i32
    %c0_i32_0 = arith.constant 0 : i32
    %c0_i32_1 = arith.constant 0 : i32
    return %c0_i32, %c0_i32_0 : i32, i32
  }
  func.func @transform_2(%arg0: i32) -> (i32, i32) {
    %c0_i32 = arith.constant 0 : i32
    %c0_i32_0 = arith.constant 0 : i32
    return %arg0, %c0_i32 : i32, i32
  }
}

</mosaic_0001>

<bundles_post_ra>
// kernel: tpu_custom_call.1
= control target key start
LH: loop header
LB: loop body
LE: loop exit
PB: predicated region body
PF: predicated region fallthrough
CT: control target
= control target key end

     0   :  { %v197_v1 = vmov 0   ;;  %s262_s0 = inlined_call_operand.vmem [shape: f32[2,1], index: 0, kind: input, shape index: {}]   ;;  %s263_s1 = inlined_call_operand.vmem [shape: f32[2,32], index: 1, kind: input, shape index: {}]   ;;  %s264_s2 = inlined_call_operand.hbm [shape: f32[2,32], index: 2, kind: output, shape index: {}]  }
   0x1   :  { %v12_v0 = vld [vmem:[%s262_s0] sm:$0x3]  ;;  %168 = vset.pattern.permute.xlu0 %v197_v1 }
   0x2   :  { %16 = vperm.xlu0 %168, %v12_v0  }
   0x3   :  { %7 = vsyncpa [#allocation3], 0  ;;  %v150_v2 = vld [vmem:[%s263_s1] ss:$0 sm:$0xff]  ;;  %v151_v3 = vld [vmem:[%s263_s1 + $0x1] ss:$0 sm:$0xff] }
   0x4   :  { %v198_v18 = vmov 2102212464   ;;  %v199_v20 = vmov 920167782   ;;  %v200_v24 = vmov 1326507024  }
   0x5   :  { %v201_v26 = vmov 683565275   ;;  %v202_v28 = vmov 2475754826   ;;  %v203_v31 = vmov 2131351028  }
   0x6   :  { %s204_s0 = smov [#allocation2]   ;;  %vm134_vm12 = vcmask 254976  }
   0x7   :  { %s142_s1 = sshll.u32 %s204_s0, 4  ;;  %s143_s1 = int_to_ptr.vmem [resolvable:$true] %s142_s1 }
   0x8   :  { %s173_s15 = scalar_lea.vmem %s143_s1, 32  ;;  %p178_p1 = scmp.lt.s32.totalorder %s143_s1, %s143_s1 }
   0x9   :  { %p174_p0 = scmp.ne.s32.totalorder %s143_s1, %s173_s15  ;;  %p179_p2 = scmp.lt.s32.totalorder %s173_s15, %s173_s15 }
   0xb   :  { %p180_p3 = por %p179_p2, %p178_p1 }
   0xd   :  { %p181_p4 = pnand %p180_p3, %p174_p0 }
  0x81   :  { %v17_v4 = vpop.permute.xlu0 %16 }
  0x82   :  { %v23_v5 = vmul.f32 %v150_v2, %v17_v4 }
  0x84   :  { %v229_v6 = vadd.f32 %v151_v3, %v23_v5 }
  0x86   :  { %v33_v7 = vand.u32 2139095040, %v229_v6  ;;  %v30_v8 = vand.u32 2147483647, %v229_v6  ;;  %vm32_vm7 = vcmp.lt.s32.totalorder %v229_v6, 0  ;;  %vm122_vm13 = vweird.f32 %v229_v6 }
  0x88   :  { %v34_v9 = vshrl.u32 %v33_v7, 23  ;;  %v37_v11 = vand.u32 8388607, %v30_v8  ;;  %vm31_vm8 = vcmp.le.f32.partialorder %v30_v8, 0.7853982 }
  0x8a   :  { %v152_v10 = vadd.s32 4294967169, %v34_v9  ;;  %v38_v14 = vor.u32 8388608, %v37_v11 }
  0x8c   :  { %v40_v12 = vadd.s32 1, %v152_v10  ;;  %v78_v22 = vshll.u32 %v38_v14, 8 }
  0x8e   :  { %vm41_vm0 = vcmp.gt.s32.totalorder %v40_v12, 0 }
  0x8f   :  { %v42_v13 = vsel %vm41_vm0, %v40_v12, 0 }
  0x90   :  { %v44_v15 = vand.u32 31, %v42_v13  ;;  %v43_v16 = vshrl.u32 %v42_v13, 5 }
  0x92   :  { %v45_v17 = vsub.s32 32, %v44_v15  ;;  %v56_v19 = vshll.u32 %v198_v18, %v44_v15  ;;  %v59_v21 = vshll.u32 %v199_v20, %v44_v15  ;;  %v47_v27 = vshll.u32 %v201_v26, %v44_v15 }
  0x93   :  { %v50_v30 = vshll.u32 %v202_v28, %v44_v15  ;;  %v53_v33 = vshll.u32 %v203_v31, %v44_v15  ;;  %vm65_vm1 = vcmp.lt.s32.totalorder %v43_v16, 4  ;;  %vm62_vm2 = vcmp.lt.s32.totalorder %v43_v16, 1 }
  0x94   :  { %v57_v23 = vshrl.u32 %v199_v20, %v45_v17  ;;  %v60_v25 = vshrl.u32 %v200_v24, %v45_v17  ;;  %v48_v29 = vshrl.u32 %v202_v28, %v45_v17  ;;  %v51_v32 = vshrl.u32 %v203_v31, %v45_v17 }
  0x95   :  { %v54_v34 = vshrl.u32 %v198_v18, %v45_v17  ;;  %v46_v38 = vshrl.u32 %v201_v26, %v45_v17  ;;  %vm63_vm3 = vcmp.lt.s32.totalorder %v43_v16, 2  ;;  %vm64_vm4 = vcmp.lt.s32.totalorder %v43_v16, 3 }
  0x96   :  { %v58_v35 = vor.u32 %v57_v23, %v56_v19  ;;  %v61_v36 = vor.u32 %v60_v25, %v59_v21  ;;  %v49_v37 = vor.u32 %v48_v29, %v47_v27  ;;  %v52_v39 = vor.u32 %v51_v32, %v50_v30 }
  0x97   :  { %v55_v40 = vor.u32 %v54_v34, %v53_v33 }
  0x98   :  { %v71_v41 = vsel %vm65_vm1, %v58_v35, 920167782  ;;  %v75_v42 = vsel %vm65_vm1, %v61_v36, 1326507024  ;;  %v70_v44 = vsel %vm62_vm2, %v49_v37, %v52_v39  ;;  %v66_v47 = vsel %vm62_vm2, %v46_v38, %v49_v37 }
  0x99   :  { %v67_v43 = vsel %vm65_vm1, %v55_v40, 2102212464  ;;  %v72_v45 = vsel %vm64_vm4, %v55_v40, %v71_v41  ;;  %v74_v46 = vsel %vm62_vm2, %v52_v39, %v55_v40  ;;  %v76_v50 = vsel %vm64_vm4, %v58_v35, %v75_v42 }
  0x9a   :  { %v68_v48 = vsel %vm64_vm4, %v52_v39, %v67_v43  ;;  %v73_v49 = vsel %vm63_vm3, %v70_v44, %v72_v45  ;;  %v77_v51 = vsel %vm63_vm3, %v74_v46, %v76_v50 }
  0x9b   :  { %v235_v52 = vmul.u32.u64.low %v78_v22, %v73_v49  ;;  %v236_v53 = vmul.u32.u64.high %v78_v22, %v73_v49, %v235_v52  ;;  %v238_v54 = vmul.u32.u64.low %v78_v22, %v77_v51  ;;  %v239_v55 = vmul.u32.u64.high %v78_v22, %v77_v51, %v238_v54 }
  0x9c   :  { %v69_v56 = vsel %vm63_vm3, %v66_v47, %v68_v48 }
  0x9d   :  { %v88_v57 = vadd.s32 1, %v236_v53  ;;  %v85_v58 = vmul.u32 %v78_v22, %v69_v56  ;;  %vm87_vm5 = vc.u32 %v239_v55, %v235_v52  ;;  %v86_v7 = vadd.s32 %v235_v52, %v239_v55 }
  0x9f   :  { %v89_v59 = vsel %vm87_vm5, %v88_v57, %v236_v53 }
  0xa0   :  { %v90_v60 = vadd.s32 %v89_v59, %v85_v58 }
  0xa2   :  { %v91_v61 = vadd.s32 536870912, %v90_v60 }
  0xa4   :  { %v92_v62 = vshrl.u32 %v91_v61, 30 }
  0xa6   :  { %v93_v63 = vshll.u32 %v92_v62, 30  ;;  %v116_v20 = vsub.s32 4, %v92_v62 }
  0xa8   :  { %v94_v0 = vsub.s32 %v90_v60, %v93_v63  ;;  %v117_v23 = vsel %vm32_vm7, %v116_v20, %v92_v62 }
  0xa9   :  { %v119_v25 = vsel %vm31_vm8, 0, %v117_v23 }
  0xaa   :  { %v96_v1 = vsub.s32 0, %v94_v0  ;;  %v123_v26 = vadd.s32 3, %v119_v25 }
  0xac   :  { %v153_v2 = vmin.u32 %v96_v1, %v94_v0  ;;  %v124_v27 = vand.u32 3, %v123_v26 }
  0xae   :  { %v98_v3 = vclz %v153_v2  ;;  %vm129_vm9 = vcmp.eq.s32.totalorder %v124_v27, 2  ;;  %vm126_vm10 = vcmp.eq.s32.totalorder %v124_v27, 0  ;;  %vm125_vm11 = vcmp.lt.s32.totalorder %v124_v27, 2 }
  0xb0   :  { %v154_v4 = vadd.s32 4294967294, %v98_v3 }
  0xb2   :  { %vm155_vm6 = vcmp.lt.s32.totalorder %v154_v4, 0 }
  0xb3   :  { %v101_v5 = vsel %vm155_vm6, 0, %v154_v4 }
  0xb4   :  { %v102_v9 = vsub.s32 32, %v101_v5  ;;  %v106_v10 = vsub.s32 4294967266, %v101_v5  ;;  %v103_v11 = vshll.u32 %v94_v0, %v101_v5 }
  0xb6   :  { %v104_v12 = vshrl.u32 %v86_v7, %v102_v9  ;;  %v107_v13 = vadd.s32 127, %v106_v10 }
  0xb8   :  { %v105_v14 = vor.u32 %v104_v12, %v103_v11  ;;  %v108_v15 = vshll.u32 %v107_v13, 23 }
  0xba   :  { %v109_v16 = vor.u32 4788187, %v108_v15  ;;  %v112_v18 = vcvt.s32.f32 %v105_v14 }
  0xbc   :  { %v110_v17 = vand.u32 2147483647, %v109_v16 }
  0xbe   :  { %v113_v19 = vmul.f32 %v112_v18, %v110_v17 }
  0xc0   :  { %v114_v21 = vxor.u32 2147483648, %v113_v19 }
  0xc2   :  { %v115_v22 = vsel %vm32_vm7, %v114_v21, %v113_v19 }
  0xc3   :  { %v118_v24 = vsel %vm31_vm8, %v229_v6, %v115_v22 }
  0xc4   :  { %169 = vcosq.f32 %v118_v24 }
  0xc5   :  { %171 = vsinq.f32 %v118_v24 }
  0xce   :  { %v170_v28 = vpop.eup %169 }
  0xcf   :  { %v172_v29 = vpop.eup %171  ;;  %v130_v30 = vxor.u32 2147483648, %v170_v28 }
  0xd0   :  { %v127_v31 = vxor.u32 2147483648, %v172_v29 }
  0xd1   :  { %v131_v32 = vsel %vm129_vm9, %v130_v30, %v172_v29 }
  0xd2   :  { %v128_v8 = vsel %vm126_vm10, %v170_v28, %v127_v31 }
  0xd3   :  { %v132_v33 = vsel %vm125_vm11, %v128_v8, %v131_v32 }
  0xd4   :  { %v133_v34 = vsel %vm122_vm13, nan, %v132_v33 }
  0xd5   :  { %135 = vst.msk [vmem:[#allocation2] sm:$0x3] %vm134_vm12, %v133_v34 }
  0xd6   :  { %184 = shalt.err (!%p181_p4)
}
  0xd7   :  { %s185_s18 = scalar_lea.hbm %s264_s2, 32 }
  0xd8   :  { %p186_p5 = scmp.ne.s32.totalorder %s264_s2, %s185_s18  ;;  %p189_p6 = scmp.lt.u32.totalorder %s185_s18, %s264_s2 }
  0xda   :  { %p191_p7 = pnand %p189_p6, %p186_p5 }
  0xdc   :  { %194 = shalt.err (!%p191_p7)
}
  0xdd   :  { %145 = dma.vmem_to_hbm [thread:$0]  %s143_s1, 32, %s264_s2, [#allocation3]  }
  0xde   :  { %195 = dma.done.wait [#allocation3], 32  }
  0xdf   :  { %196 = vsyncadd [#allocation3], 4294967264 }
  0xe0   :  { %149 = vsyncpa [#allocation3], 1 }

</bundles_post_ra>
